<compile_context>
chip_gen: v7x
topology: tpu7x:2x2x1
jax: 0.10.0
libtpu: 0.0.40
codegen_flags: <defaults>
</compile_context>

<pallas_src>
import math

import jax
import jax.numpy as jnp
from jax import lax
from jax.experimental import pallas as pl
from jax.experimental.pallas import tpu as pltpu

_INV_SQRT2 = 0.7071067811865476  # 1/sqrt(2), hoisted constant


def _gelu_exact_f32(g):
    # exact GELU (erf form), matching torch.nn.functional.gelu default
    return 0.5 * g * (1.0 + lax.erf(g * _INV_SQRT2))


def _geglu_kernel_single_k(x_ref, wa_ref, wg_ref, ba_ref, bg_ref, o_ref):
    # Fast path: full contraction in one step, no scratch accumulators.
    x = x_ref[...]
    a = jnp.dot(x, wa_ref[...], preferred_element_type=jnp.float32)
    g = jnp.dot(x, wg_ref[...], preferred_element_type=jnp.float32)
    a = a + ba_ref[...].astype(jnp.float32)
    g = g + bg_ref[...].astype(jnp.float32)
    o_ref[...] = (a * _gelu_exact_f32(g)).astype(o_ref.dtype)


def _geglu_kernel_acc(x_ref, wa_ref, wg_ref, ba_ref, bg_ref, o_ref,
                      acc_a, acc_g):
    # x_ref: (tm, tk)   wa_ref/wg_ref: (tk, tn)   ba_ref/bg_ref: (1, tn)
    # o_ref: (tm, tn)   acc_a/acc_g: (tm, tn) f32, resident across the K axis.
    k = pl.program_id(2)

    x = x_ref[...]
    da = jnp.dot(x, wa_ref[...], preferred_element_type=jnp.float32)
    dg = jnp.dot(x, wg_ref[...], preferred_element_type=jnp.float32)

    @pl.when(k == 0)
    def _():
        acc_a[...] = da
        acc_g[...] = dg

    @pl.when(k > 0)
    def _():
        acc_a[...] += da
        acc_g[...] += dg

    @pl.when(k == pl.num_programs(2) - 1)
    def _():
        a = acc_a[...] + ba_ref[...].astype(jnp.float32)
        g = acc_g[...] + bg_ref[...].astype(jnp.float32)
        o_ref[...] = (a * _gelu_exact_f32(g)).astype(o_ref.dtype)


def _round_up(a, b):
    return (a + b - 1) // b * b


def _even_split(dim, pref, granule):
    """Tile for `dim` > `pref`: even split rounded to `granule` (min padding)."""
    n_tiles = -(-dim // pref)
    return _round_up(-(-dim // n_tiles), granule)


def geglu(x, w, b, *, tm=None, tn=None, tk=None, compute_dtype=None):
    """x: (..., d_in); w: (d_in, 2*d_out); b: (2*d_out,) -> (..., d_out)."""
    d_in = x.shape[-1]
    two_d_out = w.shape[-1]
    d_out = two_d_out // 2
    lead = x.shape[:-1]
    m = math.prod(lead) if lead else 1

    out_dtype = x.dtype
    mm_dtype = jnp.dtype(compute_dtype) if compute_dtype is not None else jnp.dtype(x.dtype)
    in_isz = mm_dtype.itemsize
    out_isz = jnp.dtype(out_dtype).itemsize

    # Generation-class defaults (compute-roofline tiles for the bf16 MXU,
    # 512-class for f32 operands).  Callers tuning for v5e can pass 512s.
    if tm is None:
        tm = 1024 if in_isz <= 2 else 512
    if tn is None:
        tn = 1024 if in_isz <= 2 else 512
    if tk is None:
        tk = 1024
    m_granule = 8 if in_isz >= 4 else (16 if in_isz == 2 else 32)
    tm = max(tm, m_granule)
    tn = max(tn, 128)
    tk = max(tk, 128)

    # --- tile selection (even split -> minimal padding waste) ---
    tm_eff = _round_up(m, m_granule) if m <= tm else _even_split(m, tm, m_granule)
    tn_eff = d_out if d_out <= tn else _even_split(d_out, tn, 128)
    tk_eff = d_in if d_in <= tk else _even_split(d_in, tk, 128)

    m_pad = _round_up(m, tm_eff)
    n_pad = _round_up(d_out, tn_eff)
    k_pad = _round_up(d_in, tk_eff)
    m_grid, n_grid, k_grid = m_pad // tm_eff, n_pad // tn_eff, k_pad // tk_eff

    # Megacore guard: a single (M, N) block leaves one TensorCore idle on v7x.
    if m_grid * n_grid == 1 and m > m_granule:
        tm_eff = _round_up(-(-m // 2), m_granule)
        m_pad = _round_up(m, tm_eff)
        m_grid = m_pad // tm_eff

    # --- operand preparation ---
    x2 = x.reshape(m, d_in)
    if x2.dtype != mm_dtype:
        x2 = x2.astype(mm_dtype)
    w_c = w if w.dtype == mm_dtype else w.astype(mm_dtype)

    # Fused-weight path: index the (d_in, 2*d_out) projection directly with
    # two BlockSpecs instead of materializing sliced/padded copies in HBM.
    fused = (tn_eff % 128 == 0) and (d_out % tn_eff == 0) and (k_pad == d_in)

    if fused:
        if m_pad != m:
            x2 = jnp.pad(x2, ((0, m_pad - m), (0, 0)))
        wa_arr = wg_arr = w_c
        b2d = b.reshape(1, two_d_out)
        ba_arr = bg_arr = b2d
        j_off = d_out // tn_eff
    else:
        w_a = w_c[:, :d_out]
        w_g = w_c[:, d_out:]
        b_a = b[:d_out].reshape(1, d_out)
        b_g = b[d_out:].reshape(1, d_out)
        if m_pad != m:
            x2 = jnp.pad(x2, ((0, m_pad - m), (0, 0)))
        if k_pad != d_in:
            x2 = jnp.pad(x2, ((0, 0), (0, k_pad - d_in)))
            w_a = jnp.pad(w_a, ((0, k_pad - d_in), (0, 0)))
            w_g = jnp.pad(w_g, ((0, k_pad - d_in), (0, 0)))
        if n_pad != d_out:
            w_a = jnp.pad(w_a, ((0, 0), (0, n_pad - d_out)))
            w_g = jnp.pad(w_g, ((0, 0), (0, n_pad - d_out)))
            b_a = jnp.pad(b_a, ((0, 0), (0, n_pad - d_out)))
            b_g = jnp.pad(b_g, ((0, 0), (0, n_pad - d_out)))
        wa_arr, wg_arr, ba_arr, bg_arr = w_a, w_g, b_a, b_g
        j_off = 0

    # --- specs / kernel per path ---
    if k_grid == 1:
        grid = (m_grid, n_grid)
        x_spec = pl.BlockSpec((tm_eff, k_pad), lambda i, j: (i, 0))
        wa_spec = pl.BlockSpec((tk_eff, tn_eff), lambda i, j: (0, j))
        wg_spec = pl.BlockSpec((tk_eff, tn_eff), lambda i, j: (0, j + j_off))
        ba_spec = pl.BlockSpec((1, tn_eff), lambda i, j: (0, j))
        bg_spec = pl.BlockSpec((1, tn_eff), lambda i, j: (0, j + j_off))
        out_spec = pl.BlockSpec((tm_eff, tn_eff), lambda i, j: (i, j))
        kernel = _geglu_kernel_single_k
        scratch = []
        dims = ("parallel", "parallel")
    else:
        grid = (m_grid, n_grid, k_grid)
        x_spec = pl.BlockSpec((tm_eff, tk_eff), lambda i, j, k: (i, k))
        wa_spec = pl.BlockSpec((tk_eff, tn_eff), lambda i, j, k: (k, j))
        wg_spec = pl.BlockSpec((tk_eff, tn_eff), lambda i, j, k: (k, j + j_off))
        ba_spec = pl.BlockSpec((1, tn_eff), lambda i, j, k: (0, j))
        bg_spec = pl.BlockSpec((1, tn_eff), lambda i, j, k: (0, j + j_off))
        out_spec = pl.BlockSpec((tm_eff, tn_eff), lambda i, j, k: (i, j))
        kernel = _geglu_kernel_acc
        scratch = [pltpu.VMEM((tm_eff, tn_eff), jnp.float32),
                   pltpu.VMEM((tm_eff, tn_eff), jnp.float32)]
        dims = ("parallel", "parallel", "arbitrary")

    # --- VMEM budget: double-buffered streamed blocks + resident f32 accs ---
    footprint = 2 * (tm_eff * tk_eff + 2 * tk_eff * tn_eff + 2 * tn_eff) * in_isz
    footprint += 2 * tm_eff * tn_eff * out_isz
    if k_grid > 1:
        footprint += 2 * tm_eff * tn_eff * 4
    vmem_limit = int(min(max(footprint + (8 << 20), 32 << 20), 56 << 20))

    # Bytes reflect the actual streaming pattern: x is read n_grid times and
    # each weight m_grid times with this (i, j, k) grid ordering.
    cost = pl.CostEstimate(
        flops=2 * m * d_in * two_d_out,
        transcendentals=m * d_out,  # one erf per output element
        bytes_accessed=int((m_pad * k_pad * n_grid
                            + 2 * k_pad * n_pad * m_grid
                            + 2 * n_pad) * in_isz
                           + m_pad * n_pad * out_isz),
    )

    out = pl.pallas_call(
        kernel,
        out_shape=jax.ShapeDtypeStruct((m_pad, n_pad), out_dtype),
        grid_spec=pltpu.PrefetchScalarGridSpec(
            num_scalar_prefetch=0,
            grid=grid,
            in_specs=[x_spec, wa_spec, wg_spec, ba_spec, bg_spec],
            out_specs=out_spec,
            scratch_shapes=scratch,
        ),
        compiler_params=pltpu.CompilerParams(
            dimension_semantics=dims,
            vmem_limit_bytes=vmem_limit,
        ),
        cost_estimate=cost,
    )(x2, wa_arr, wg_arr, ba_arr, bg_arr)

    out = out[:m, :d_out]
    return out.reshape(*lead, d_out)


if __name__ == "__main__":
    key = jax.random.PRNGKey(0)

    def make_linear_params(kw, kb, d_in, d_out, dtype=jnp.float32):
        # nn.Linear(d_in, 2*d_out): weight (2*d_out, d_in), bias (2*d_out,)
        bound = 1.0 / jnp.sqrt(jnp.float32(d_in))
        w_torch = jax.random.uniform(kw, (2 * d_out, d_in),
                                     minval=-bound, maxval=bound, dtype=dtype)
        b_lin = jax.random.uniform(kb, (2 * d_out,),
                                   minval=-bound, maxval=bound, dtype=dtype)
        return w_torch.T, b_lin  # (d_in, 2*d_out), (2*d_out,)

    def reference(x, w, b, d_out):
        h = x @ w + b
        a, g = h[..., :d_out], h[..., d_out:]
        return a * (0.5 * g * (1.0 + lax.erf(g * _INV_SQRT2)))

    keys = jax.random.split(key, 9)

    # --- primary small check (module-consistent: batch=2, seq=8, d=32) ---
    batch, seq, d_in, d_out = 2, 8, 32, 32
    x = jax.random.normal(keys[0], (batch, seq, d_in), dtype=jnp.float32)
    w, b_lin = make_linear_params(keys[1], keys[2], d_in, d_out)
    y = geglu(x, w, b_lin)
    jax.block_until_ready(y)
    y_ref = reference(x, w, b_lin, d_out)
    assert y.shape == (batch, seq, d_out)
    assert jnp.allclose(y, y_ref, atol=1e-4, rtol=1e-4), "mismatch (small)"

    # --- second check: rows not a multiple of the tile (padding / multi-step
    #     M grid) and non-128-multiple feature dims (fallback split path) ---
    batch2, seq2, d_in2, d_out2 = 2, 300, 96, 80
    x2 = jax.random.normal(keys[3], (batch2, seq2, d_in2), dtype=jnp.float32)
    w2, b2 = make_linear_params(keys[4], keys[5], d_in2, d_out2)
    y2 = geglu(x2, w2, b2)
    jax.block_until_ready(y2)
    y2_ref = reference(x2, w2, b2, d_out2)
    assert y2.shape == (batch2, seq2, d_out2)
    assert jnp.allclose(y2, y2_ref, atol=1e-4, rtol=1e-4), "mismatch (padded)"

    # --- third check: forces k_grid>1 and the fused-weight (no split/pad)
    #     path with the K-accumulate kernel, via small tile overrides ---
    batch3, seq3, d_in3, d_out3 = 2, 64, 256, 256
    x3 = jax.random.normal(keys[6], (batch3, seq3, d_in3), dtype=jnp.float32)
    w3, b3 = make_linear_params(keys[7], keys[8], d_in3, d_out3)
    y3 = geglu(x3, w3, b3, tn=128, tk=128)
    jax.block_until_ready(y3)
    y3_ref = reference(x3, w3, b3, d_out3)
    assert y3.shape == (batch3, seq3, d_out3)
    assert jnp.allclose(y3, y3_ref, atol=2e-3, rtol=2e-3), "mismatch (fused/acc)"

    print("KERNEL_OK")
</pallas_src>

<mosaic_0001>
module attributes {stable_mosaic.version = 11 : i64} {
  func.func @_geglu_kernel_single_k(%arg0: i32, %arg1: i32, %arg2: memref<8x32xf32, #tpu.memory_space<vmem>>, %arg3: memref<32x32xf32, #tpu.memory_space<vmem>>, %arg4: memref<32x32xf32, #tpu.memory_space<vmem>>, %arg5: memref<1x32xf32, #tpu.memory_space<vmem>>, %arg6: memref<1x32xf32, #tpu.memory_space<vmem>>, %arg7: memref<8x32xf32, #tpu.memory_space<vmem>>) attributes {dimension_semantics = [#tpu.dimension_semantics<parallel>, #tpu.dimension_semantics<parallel>], iteration_bounds = array<i64: 2, 1>, scalar_prefetch = 0 : i64, scratch_operands = 0 : i64, tpu.core_type = #tpu.core_type<tc>, window_params = [{transform_indices = @transform_0, window_bounds = array<i64: 8, 32>}, {transform_indices = @transform_1, window_bounds = array<i64: 32, 32>}, {transform_indices = @transform_2, window_bounds = array<i64: 32, 32>}, {transform_indices = @transform_3, window_bounds = array<i64: 1, 32>}, {transform_indices = @transform_4, window_bounds = array<i64: 1, 32>}, {transform_indices = @transform_5, window_bounds = array<i64: 8, 32>}]} {
    %c0 = arith.constant 0 : index
    %c0_0 = arith.constant 0 : index
    %0 = vector.load %arg2[%c0, %c0_0] : memref<8x32xf32, #tpu.memory_space<vmem>>, vector<8x32xf32>
    %c0_1 = arith.constant 0 : index
    %c0_2 = arith.constant 0 : index
    %1 = vector.load %arg3[%c0_1, %c0_2] : memref<32x32xf32, #tpu.memory_space<vmem>>, vector<32x32xf32>
    %cst = arith.constant dense<0.000000e+00> : vector<8x32xf32>
    %2 = tpu.matmul %0, %1, %cst {dimension_numbers = #tpu.dot_dimension_numbers<[1], [0], [0], [1], [0, 0, 1, 1], [], []>} : vector<8x32xf32>, vector<32x32xf32>, vector<8x32xf32> -> vector<8x32xf32>
    %c0_3 = arith.constant 0 : index
    %c0_4 = arith.constant 0 : index
    %3 = vector.load %arg4[%c0_3, %c0_4] : memref<32x32xf32, #tpu.memory_space<vmem>>, vector<32x32xf32>
    %cst_5 = arith.constant dense<0.000000e+00> : vector<8x32xf32>
    %4 = tpu.matmul %0, %3, %cst_5 {dimension_numbers = #tpu.dot_dimension_numbers<[1], [0], [0], [1], [0, 0, 1, 1], [], []>} : vector<8x32xf32>, vector<32x32xf32>, vector<8x32xf32> -> vector<8x32xf32>
    %c0_6 = arith.constant 0 : index
    %c0_7 = arith.constant 0 : index
    %5 = vector.load %arg5[%c0_6, %c0_7] : memref<1x32xf32, #tpu.memory_space<vmem>>, vector<1x32xf32>
    %6 = vector.broadcast %5 : vector<1x32xf32> to vector<8x32xf32>
    %7 = arith.addf %2, %6 : vector<8x32xf32>
    %c0_8 = arith.constant 0 : index
    %c0_9 = arith.constant 0 : index
    %8 = vector.load %arg6[%c0_8, %c0_9] : memref<1x32xf32, #tpu.memory_space<vmem>>, vector<1x32xf32>
    %9 = vector.broadcast %8 : vector<1x32xf32> to vector<8x32xf32>
    %10 = arith.addf %4, %9 : vector<8x32xf32>
    %cst_10 = arith.constant 5.000000e-01 : f32
    %11 = vector.broadcast %cst_10 : f32 to vector<8x32xf32>
    %12 = arith.mulf %11, %10 : vector<8x32xf32>
    %cst_11 = arith.constant 0.707106769 : f32
    %13 = vector.broadcast %cst_11 : f32 to vector<8x32xf32>
    %14 = arith.mulf %10, %13 : vector<8x32xf32>
    %15 = math.erf %14 : vector<8x32xf32>
    %cst_12 = arith.constant 1.000000e+00 : f32
    %16 = vector.broadcast %cst_12 : f32 to vector<8x32xf32>
    %17 = arith.addf %16, %15 : vector<8x32xf32>
    %18 = arith.mulf %12, %17 : vector<8x32xf32>
    %19 = arith.mulf %7, %18 : vector<8x32xf32>
    %c0_13 = arith.constant 0 : index
    %c0_14 = arith.constant 0 : index
    %20 = vector.load %arg7[%c0_13, %c0_14] : memref<8x32xf32, #tpu.memory_space<vmem>>, vector<8x32xf32>
    tpu.vector_store %arg7[%c0_13, %c0_14], %19 {strides = array<i32>} : memref<8x32xf32, #tpu.memory_space<vmem>>, vector<8x32xf32>,
    return
  }
  func.func @transform_0(%arg0: i32, %arg1: i32) -> (i32, i32) {
    %c0_i32 = arith.constant 0 : i32
    %c0_i32_0 = arith.constant 0 : i32
    return %arg0, %c0_i32 : i32, i32
  }
  func.func @transform_1(%arg0: i32, %arg1: i32) -> (i32, i32) {
    %c0_i32 = arith.constant 0 : i32
    %c0_i32_0 = arith.constant 0 : i32
    return %c0_i32, %arg1 : i32, i32
  }
  func.func @transform_2(%arg0: i32, %arg1: i32) -> (i32, i32) {
    %c0_i32 = arith.constant 0 : i32
    %0 = arith.addi %arg1, %c0_i32 : i32
    %c0_i32_0 = arith.constant 0 : i32
    %c0_i32_1 = arith.constant 0 : i32
    return %c0_i32_0, %0 : i32, i32
  }
  func.func @transform_3(%arg0: i32, %arg1: i32) -> (i32, i32) {
    %c0_i32 = arith.constant 0 : i32
    %c0_i32_0 = arith.constant 0 : i32
    return %c0_i32, %arg1 : i32, i32
  }
  func.func @transform_4(%arg0: i32, %arg1: i32) -> (i32, i32) {
    %c0_i32 = arith.constant 0 : i32
    %0 = arith.addi %arg1, %c0_i32 : i32
    %c0_i32_0 = arith.constant 0 : i32
    %c0_i32_1 = arith.constant 0 : i32
    return %c0_i32_0, %0 : i32, i32
  }
  func.func @transform_5(%arg0: i32, %arg1: i32) -> (i32, i32) {
    %c0_i32 = arith.constant 0 : i32
    return %arg0, %arg1 : i32, i32
  }
}

</mosaic_0001>

<bundles_post_ra>
// kernel: tpu_custom_call.1
= control target key start
LH: loop header
LB: loop body
LE: loop exit
PB: predicated region body
PF: predicated region fallthrough
CT: control target
= control target key end

     0   :  { %10 = vsyncpa [#allocation3], 0  ;;  %s1273_s0 = inlined_call_operand.hbm [shape: f32[16,32], index: 0, kind: input, shape index: {}]   ;;  %s1274_s1 = inlined_call_operand.hbm [shape: f32[32,32], index: 1, kind: input, shape index: {}]   ;;  %s1275_s2 = inlined_call_operand.hbm [shape: f32[32,32], index: 2, kind: input, shape index: {}]   ;;  %s1276_s3 = inlined_call_operand.vmem [shape: f32[1,32], index: 3, kind: input, shape index: {}]   ;;  %s1277_s4 = inlined_call_operand.vmem [shape: f32[1,32], index: 4, kind: input, shape index: {}]   ;;  %s1278_s5 = inlined_call_operand.hbm [shape: f32[16,32], index: 5, kind: output, shape index: {}]  }
   0x1   :  { %12 = vsyncpa [#allocation3 + $0x1], 0 }
   0x2   :  { %13 = vsyncpa [#allocation6], 0 }
   0x3   :  { %14 = vsyncpa [#allocation4], 0 }
   0x4   :  { %16 = vsyncpa [#allocation4 + $0x1], 0  ;;  %s1010_s18 = smov 0   ;;  %s1012_s19 = smov 0  }
   0x5   :  { %s1014_s20 = smov 0   ;;  %s1016_s21 = smov 0  }
   0x6   :  { %s1018_s22 = smov 0   ;;  %s1020_s23 = smov 0  }
   0x7 LB: > { %s640_s24 = sadd.s32 4294967295, %s969_s23   ;;  %s641_s25 = sadd.s32 4294967294, %s969_s23   ;;  %s969_s23 = sphi %s1020_s23, %s22_s23   ;;  %s965_s22 = sphi %s1018_s22, %s1300_s22   ;;  %s961_s21 = sphi %s1016_s21, %s1299_s21   ;;  %s957_s20 = sphi %s1014_s20, %s1298_s20   ;;  %s953_s19 = sphi %s1012_s19, %s1297_s19   ;;  %s949_s18 = sphi %s1010_s18, %s1296_s18  }
   0x8   : > { %p54_p0 = scmp.ne.s32.totalorder %s953_s19, %s949_s18  ;;  %p1044_p1 = scmp.eq.s32.totalorder %s640_s24, 0 }
   0x9   : > { %p1048_p2 = scmp.eq.s32.totalorder %s640_s24, 1  ;;  %p190_p3 = scmp.eq.s32.totalorder %s641_s25, 1 }
   0xa   : > { %s1283_s26 = scalar_select %p1044_p1, 1, 0 }
   0xb   : > { %p1054_p4 = por %p1044_p1, %p54_p0  ;;  %p642_p5 = scmp.ge.s32.totalorder %s969_s23, 1 }
   0xc   : > { %p1059_p6 = por %p190_p3, %p54_p0  ;;  %p197_p7 = scmp.lt.s32.totalorder %s969_s23, 3 }
   0xd   : > { %s1285_s28 = scalar_select %p1054_p4, 1, 0 }
   0xe   : > { %s1286_s29 = scalar_select %p1059_p6, 1, 0 }
   0xf   : > { %p1064_p8 = pnand %p642_p5, %p197_p7  ;;  %s971_s6 = smov [#allocation5]  }
  0x10   : > { %s211_s7 = sshll.u32 %s971_s6, 4  ;;  %s972_s9 = smov [#allocation7]   ;;  %s1068_s7 = int_to_ptr.vmem [resolvable:$true] %s211_s7 }
  0x11   : > { %p719_p9 = pneg %p1064_p8  ;;  %s226_s10 = sshll.u32 %s972_s9, 4  ;;  %s1079_s10 = int_to_ptr.vmem [resolvable:$true] %s226_s10 }
  0x12   : > { %s797_s13 = scalar_lea.hbm %s1274_s1, 512 }
  0x13   : > { %p1075_p11 = pnand %p719_p9, %p1044_p1  ;;  %p798_p12 = scmp.ne.s32.totalorder %s1274_s1, %s797_s13 }
  0x14   : > { %p804_p5 = scmp.lt.u32.totalorder %s797_s13, %s1274_s1 }
  0x15   : > { %p799_p13 = pneg %p1075_p11 }
  0x17   : > { %p800_p0 = pnand %p799_p13, %p798_p12 }
  0x19   : > { %p801_p3 = pneg %p800_p0 }
  0x1b   : > { %p806_p7 = pnand %p804_p5, %p801_p3 }
  0x1d   : > { %809 = shalt.err (!%p806_p7)
}
  0x1e   : > { %s810_s24 = scalar_lea.vmem %s1068_s7, 512  ;;  %p818_p1 = scmp.lt.s32.totalorder %s1068_s7, %s1068_s7 }
  0x1f   : > { %p811_p9 = scmp.ne.s32.totalorder %s1068_s7, %s810_s24  ;;  %p819_p12 = scmp.lt.s32.totalorder %s810_s24, %s810_s24 }
  0x21   : > { %p813_p10 = pnand %p811_p9, %p799_p13  ;;  %p820_p0 = por %p819_p12, %p818_p1 }
  0x23   : > { %p814_p6 = pneg %p813_p10 }
  0x25   : > { %p821_p4 = pnand %p820_p0, %p814_p6 }
  0x27   : > { %824 = shalt.err (!%p821_p4)
}
  0x28   : > { %s973_s25 = smov 128   ;;  %s974_s6 = smov 8  }
  0x29   : > { %722 = dma.hbm_to_vmem [thread:$0]  (!%p1075_p11), %s1274_s1, 512, %s1068_s7, [#allocation6], %s973_s25, %s973_s25, %s974_s6  }
  0x2a   : > { %s825_s14 = scalar_lea.hbm %s1275_s2, 512 }
  0x2b   : > { %p826_p1 = scmp.ne.s32.totalorder %s1275_s2, %s825_s14  ;;  %p832_p10 = scmp.lt.u32.totalorder %s825_s14, %s1275_s2 }
  0x2d   : > { %p828_p4 = pnand %p826_p1, %p799_p13 }
  0x2f   : > { %p829_p6 = pneg %p828_p4 }
  0x31   : > { %p834_p3 = pnand %p832_p10, %p829_p6 }
  0x33   : > { %837 = shalt.err (!%p834_p3)
}
  0x34   : > { %s838_s7 = scalar_lea.vmem %s1079_s10, 512  ;;  %p846_p12 = scmp.lt.s32.totalorder %s1079_s10, %s1079_s10 }
  0x35   : > { %p839_p5 = scmp.ne.s32.totalorder %s1079_s10, %s838_s7  ;;  %p847_p0 = scmp.lt.s32.totalorder %s838_s7, %s838_s7 }
  0x37   : > { %p841_p7 = pnand %p839_p5, %p799_p13  ;;  %p848_p1 = por %p847_p0, %p846_p12 }
  0x39   : > { %p842_p9 = pneg %p841_p7 }
  0x3b   : > { %p849_p4 = pnand %p848_p1, %p842_p9 }
  0x3d   : > { %852 = shalt.err (!%p849_p4)
}
  0x3e   : > { %725 = dma.hbm_to_vmem [thread:$0]  (!%p1075_p11), %s1275_s2, 512, %s1079_s10, [#allocation6], %s973_s25, %s973_s25, %s974_s6  }
  0x3f   : > { %s34_s12 = sadd.s32 1, %s965_s22  ;;  %s41_s13 = sadd.s32 1, %s957_s20 }
  0x40   : > { %p36_p13 = scmp.ge.s32.totalorder %s34_s12, 2  ;;  %p48_p6 = scmp.ne.s32.totalorder %s957_s20, %s953_s19 }
  0x41   : > { %p49_p10 = scmp.eq.s32.totalorder %s969_s23, 0  ;;  %p736_p3 = scmp.lt.s32.totalorder %s969_s23, 2 }
  0x42   : > { %s1302_s12 = smov (%p36_p13, %s34_s12), 0  ;;  %p1143_p7 = por %p1048_p2, %p48_p6 }
  0x43   : > { %p50_p5 = por %p49_p10, %p48_p6  ;;  %s38_s14 = ssub.s32 %s965_s22, %s1302_s12 }
  0x44   : > { %s1289_s8 = scalar_select %p1143_p7, 1, 0 }
  0x45   : > { %s252_s15 = sand.u32 1, %s957_s20   ;;  %p39_p9 = scmp.eq.s32.totalorder %s38_s14, 0 }
  0x46   : > { %s648_s10 = sshll.u32 %s252_s15, 3  ;;  %s649_s25 = sshll.u32 %s965_s22, 7 }
  0x47   : > { %s1152_s6 = scalar_select %p39_p9, %s957_s20, %s41_s13  }
  0x48   : > { %s1157_s24 = scalar_lea.hbm %s1273_s0, %s649_s25  ;;  %s256_s27 = scalar_lea.vmem [#allocation2], %s648_s10 }
  0x49   : > { %s263_s7 = sshll.u32 %s256_s27, 4  ;;  %p1161_p2 = pnand %p736_p3, %p50_p5  ;;  %s1165_s7 = int_to_ptr.vmem [resolvable:$true] %s263_s7 }
  0x4a   : > { %s253_s11 = scalar_lea.sflag [#allocation3], %s252_s15  ;;  %s853_s13 = scalar_lea.hbm %s1157_s24, 128 }
  0x4b   : > { %p854_p11 = scmp.ne.s32.totalorder %s1157_s24, %s853_s13  ;;  %p855_p12 = pneg %p1161_p2 }
  0x4c   : > { %s858_s25 = scalar_lea.hbm %s1273_s0, 256  ;;  %p859_p4 = scmp.lt.u32.totalorder %s1157_s24, %s1273_s0 }
  0x4d   : > { %p856_p0 = pnand %p855_p12, %p854_p11  ;;  %p860_p13 = scmp.lt.u32.totalorder %s858_s25, %s853_s13 }
  0x4e   : > { %p862_p10 = scmp.lt.u32.totalorder %s853_s13, %s1157_s24 }
  0x4f   : > { %p857_p1 = pneg %p856_p0  ;;  %p861_p6 = por %p860_p13, %p859_p4 }
  0x51   : > { %p863_p3 = por %p862_p10, %p861_p6 }
  0x53   : > { %p864_p5 = pnand %p863_p3, %p857_p1 }
  0x55   : > { %867 = shalt.err (!%p864_p5)
}
  0x56   : > { %s868_s15 = scalar_lea.vmem %s1165_s7, 128  ;;  %s975_s27 = smov [#allocation2]  }
  0x57   : > { %p869_p9 = scmp.ne.s32.totalorder %s1165_s7, %s868_s15  ;;  %s873_s14 = sshll.u32 %s975_s27, 4  ;;  %s874_s14 = int_to_ptr.vmem [resolvable:$false] %s873_s14 }
  0x58   : > { %s875_s10 = scalar_lea.vmem %s874_s14, 256  ;;  %p876_p7 = scmp.lt.s32.totalorder %s1165_s7, %s874_s14 }
  0x59   : > { %p871_p11 = pnand %p869_p9, %p855_p12  ;;  %p877_p4 = scmp.lt.s32.totalorder %s875_s10, %s868_s15 }
  0x5b   : > { %p872_p0 = pneg %p871_p11  ;;  %p878_p13 = por %p877_p4, %p876_p7 }
  0x5d   : > { %p879_p6 = pnand %p878_p13, %p872_p0 }
  0x5f   : > { %882 = shalt.err (!%p879_p6)
}
  0x60   : > { %729 = dma.hbm_to_vmem [thread:$0]  (!%p1161_p2), %s1157_s24, 128, %s1165_s7, %s253_s11  }
  0x61   : > { %272 = sbr.rel (%p1064_p8) target bundleno = 366 (0x16e), region = 40  ;;  %s1195_s13 = sand.u32 (!%p1064_p8), 1, %s953_s19  }
  0x62   : > { %s651_s25 = sshll.u32 (!%p1064_p8), %s1195_s13, 3  ;;  %s275_s16 = scalar_lea.sflag (!%p1064_p8), [#allocation3], %s1195_s13 }
  0x63   : > { %s278_s17 = scalar_lea.vmem (!%p1064_p8), [#allocation2], %s651_s25  ;;  %p1291_p7 = scmp.ne.s32.totalorder (!%p1064_p8), %s1285_s28, 0 }
  0x68   : > { %936 = dma.done.wait (%p1291_p7), %s275_s16, 128  }
  0x69   : > { %938 = vsyncadd (%p1291_p7), %s275_s16, 4294967168  ;;  %p1292_p2 = scmp.ne.s32.totalorder %s1283_s26, 0 }
  0x6b   : > { %940 = dma.done.wait (%p1292_p2), [#allocation6], 1024  }
  0x6c   : > { %942 = vsyncadd (%p1292_p2), [#allocation6], 4294966272  ;;  %v976_v0 = vmov 0.0|0.0   ;;  %vm977_vm0 = vmmov 0   ;;  %v978_v1 = vmov 0.0   ;;  %v330_v2 = vld [vmem:[#allocation7] sm:$0xff] }
  0x6d   : > { %701 = vmatprep.subr.bf16.mxu1 %v976_v0  ;;  %692 = vmatprep.mubr.msk.f32.mxu1 %vm977_vm0, %v978_v1  ;;  %v331_v3 = vld [vmem:[#allocation7 + $0x8] sm:$0xff]  ;;  %v332_v4 = vld [vmem:[#allocation7 + $0x10] sm:$0xff]  ;;  %v333_v6 = vld [vmem:[#allocation7 + $0x18] sm:$0xff]  ;;  %vm341_vm1 = vcmask 261120   ;;  %s660_s7 = sshll.u32 %s961_s21, 7  ;;  %s318_s9 = scalar_lea.vmem [#allocation8], %s651_s25 }
  0x6e   : > { %695 = vmatprep.subr.bf16.mxu0 %v976_v0  ;;  %681 = vmatprep.mubr.msk.f32.mxu0 %vm977_vm0, %v978_v1  ;;  %v702_v5 = vpack.c.bf16 %v331_v3, %v330_v2  ;;  %v326_v7 = vld [vmem:[#allocation5] sm:$0xff]  ;;  %v327_v8 = vld [vmem:[#allocation5 + $0x8] sm:$0xff]  ;;  %v328_v9 = vld [vmem:[#allocation5 + $0x10] sm:$0xff]  ;;  %v705_v11 = vpack.c.bf16 %v333_v6, %v332_v4  ;;  %s514_s11 = sshll.u32 %s318_s9, 4  ;;  %s1223_s14 = scalar_lea.hbm %s1278_s5, %s660_s7  ;;  %s1225_s11 = int_to_ptr.vmem [resolvable:$true] %s514_s11 }
  0x6f   : > { %v329_v10 = vld [vmem:[#allocation5 + $0x18] sm:$0xff]  ;;  %v696_v12 = vpack.c.bf16 %v327_v8, %v326_v7  ;;  %v657_v15 = vld [vmem:[%s1277_s4] ss:$0 sm:$0xff]  ;;  %s500_s10 = scalar_lea.sflag [#allocation4], %s1195_s13  ;;  %s883_s16 = scalar_lea.vmem %s1225_s11, 128 }
  0x70   : > { %703 = vmatpush3.bf16.msra.mxu1 %v702_v5  ;;  %v699_v13 = vpack.c.bf16 %v329_v10, %v328_v9  ;;  %v325_v14 = vld [vmem:[%s278_s17] sm:$0xff]  ;;  %p884_p8 = scmp.ne.s32.totalorder %s1225_s11, %s883_s16  ;;  %p1293_p12 = scmp.ne.s32.totalorder %s1289_s8, 0 }
  0x71   : > { %704 = vmatprep.subr.bf16.mxu1 %v976_v0  ;;  %697 = vmatpush3.bf16.msra.mxu0 %v696_v12  ;;  %v655_v22 = vld [vmem:[%s1276_s3] ss:$0 sm:$0xff]  ;;  %s979_s21 = smov [#allocation8]  }
  0x72   : > { %698 = vmatprep.subr.bf16.mxu0 %v976_v0  ;;  %p885_p1 = pnand %p884_p8, %p1293_p12  ;;  %s887_s25 = sshll.u32 %s979_s21, 4  ;;  %s888_s25 = int_to_ptr.vmem [resolvable:$false] %s887_s25 }
  0x73   : > { %s889_s17 = scalar_lea.vmem %s888_s25, 256  ;;  %p890_p3 = scmp.lt.s32.totalorder %s1225_s11, %s888_s25 }
  0x74   : > { %706 = vmatpush3.bf16.msra.mxu1 %v705_v11  ;;  %p886_p10 = pneg %p885_p1  ;;  %p891_p5 = scmp.lt.s32.totalorder %s889_s17, %s883_s16 }
  0x75   : > { %700 = vmatpush3.bf16.msra.mxu0 %v699_v13 }
  0x76   : > { %p892_p9 = por %p891_p5, %p890_p3 }
  0x77   : > { %693 = vmatmul.mubr.msk.f32.vlgmr.msra.gmra.mrb[0].mxu1 %vm341_vm1, %v325_v14 }
  0x78   : > { %682 = vmatmul.mubr.msk.f32.vlgmr.msra.gmra.mrb[0].mxu0 %vm341_vm1, %v325_v14  ;;  %p893_p11 = pnand %p892_p9, %p886_p10 }
 0x14a   : > { %v488_v16 = vpop.f32.mrb[0].mxu1 }
 0x14b   : > { %v489_v17 = vadd.f32 %v657_v15, %v488_v16  ;;  %v694_v18 = vpop.f32.mrb[1].mxu1  ;;  %v411_v19 = vpop.f32.mrb[0].mxu0 }
 0x14c   : > { %v683_v21 = vpop.f32.mrb[1].mxu0  ;;  %v412_v26 = vadd.f32 %v655_v22, %v411_v19 }
 0x14d   : > { %v493_v20 = vmul.f32 0.70710677, %v489_v17  ;;  %v492_v24 = vmul.f32 0.5, %v489_v17 }
 0x14f   : > { %795 = verf.f32 %v493_v20 }
 0x159   : > { %v796_v23 = vpop.eup %795 }
 0x15a   : > { %v495_v25 = vadd.f32 1.0, %v796_v23 }
 0x15c   : > { %v496_v27 = vmul.f32 %v495_v25, %v492_v24 }
 0x15e   : > { %v497_v28 = vmul.f32 %v496_v27, %v412_v26 }
 0x160   : > { %498 = vst.msk [vmem:[%s318_s9] sm:$0xff] %vm341_vm1, %v497_v28 }
 0x161   : > { %896 = shalt.err (!%p893_p11)
}
 0x162   : > { %s897_s13 = scalar_lea.hbm %s1223_s14, 128  ;;  %s901_s30 = scalar_lea.hbm %s1278_s5, 256 }
 0x163   : > { %p898_p0 = scmp.ne.s32.totalorder %s1223_s14, %s897_s13  ;;  %p902_p6 = scmp.lt.u32.totalorder %s1223_s14, %s1278_s5 }
 0x164   : > { %p903_p7 = scmp.lt.u32.totalorder %s901_s30, %s897_s13  ;;  %p905_p8 = scmp.lt.u32.totalorder %s897_s13, %s1223_s14 }
 0x165   : > { %p899_p4 = pnand %p898_p0, %p1293_p12 }
 0x166   : > { %p904_p2 = por %p903_p7, %p902_p6 }
 0x167   : > { %p900_p13 = pneg %p899_p4 }
 0x168   : > { %p906_p1 = por %p905_p8, %p904_p2 }
 0x16a   : > { %p907_p10 = pnand %p906_p1, %p900_p13 }
 0x16c   : > { %910 = shalt.err (!%p907_p10)
}
 0x16d   : > { %717 = dma.vmem_to_hbm [thread:$0]  (%p1293_p12), %s1225_s11, 128, %s1223_s14, %s500_s10  }
 0x16e PF: > { %s526_s9 = sand.u32 1, %s949_s18   ;;  %p1294_p3 = scmp.ne.s32.totalorder %s1286_s29, 0 }
 0x16f   : > { %p1295_p5 = scmp.ge.s32.totalorder %s969_s23, 2  ;;  %s527_s15 = scalar_lea.sflag [#allocation4], %s526_s9 }
 0x171   : > { %p731_p9 = pnand %p1295_p5, %p1294_p3 }
 0x173   : > { %944 = dma.done.wait (!%p731_p9), %s527_s15, 128  }
 0x174   : > { %946 = vsyncadd (!%p731_p9), %s527_s15, 4294967168  ;;  %s22_s23 = sadd.s32 1, %s969_s23   ;;  %s1296_s18 = smov %s953_s19 }
 0x175   : > { %p19_p11 = scmp.ge.s32.totalorder %s22_s23, 4   ;;  %s1297_s19 = smov %s957_s20 }
 0x176   : > { %s1298_s20 = smov %s1152_s6  ;;  %s1299_s21 = smov %s965_s22 }
 0x177   : > { %s1300_s22 = smov %s1302_s12  ;;  %21 = sbr.rel (!%p19_p11) target bundleno = 7 (0x7), region = 101 }
 0x17e   :  { %532 = vsyncpa [#allocation3], 1 }
 0x17f   :  { %534 = vsyncpa [#allocation3 + $0x1], 1 }
 0x180   :  { %535 = vsyncpa [#allocation6], 1 }
 0x181   :  { %536 = vsyncpa [#allocation4], 1 }
 0x182   :  { %538 = vsyncpa [#allocation4 + $0x1], 1 }

</bundles_post_ra>
